<compile_context>
chip_gen: v7x
topology: tpu7x:2x2x1
jax: 0.10.0
libtpu: 0.0.40
codegen_flags: <defaults>
</compile_context>

<pallas_src>
import jax
import jax.numpy as jnp
from jax.experimental import pallas as pl
from jax.experimental.pallas import tpu as pltpu

Z_DIM = 2
EMBEDDING_ACTION_SIZE = 1   # action enters forward() as a raw (B, 1) column
NB_ACTIONS = 4
HIDDEN = 256
IN_DIM = Z_DIM + EMBEDDING_ACTION_SIZE  # 3
W3_PAD = 128                # lane-padded fc3 weight width (dense MXU pass); output is NOT padded

_SELU_ALPHA = 1.6732632423543772
_SELU_SCALE = 1.0507009873554805


def _selu(x):
    # F.selu: scale * (max(0, x) + min(0, alpha * expm1(x))).
    # Clamp the negative-branch argument so exp never sees large positives (no inf on the
    # discarded branch).  exp(x)-1 has abs error ~1e-7 near 0, well inside tolerance, and
    # costs far fewer VALU issues than a polynomial expm1 (matters on v5e).
    xn = jnp.minimum(x, 0.0)
    return _SELU_SCALE * jnp.where(x > 0.0, x, _SELU_ALPHA * (jnp.exp(xn) - 1.0))


def ff_kernel(x_ref, w1_ref, b1_ref, w2_ref, b2_ref, w3_ref, b3_ref, o_ref):
    x = x_ref[...]                              # (TB, 3) f32: [z0, z1, action.float()]

    # Layer 1 (K = 3): broadcast FMAs on the VPU (a K=3 MXU pass would be <2% util).
    h = b1_ref[...]                             # (1, 256) broadcast
    for k in range(IN_DIM):
        h = h + x[:, k:k + 1] * w1_ref[k:k + 1, :]
    h = _selu(h)                                # (TB, 256) f32

    # Layer 2: 256x256 MXU matmul (bf16 operands by default); f32 accumulate; f32 SELU.
    h = jnp.dot(h.astype(w2_ref.dtype), w2_ref[...],
                preferred_element_type=jnp.float32) + b2_ref[...]
    h = _selu(h)

    # Layer 3: 256x128 zero-padded MXU pass, then keep only the real Z_DIM lanes and
    # store a narrow (TB, Z_DIM) block (no 128-lane padded writeback).
    h3 = jnp.dot(h.astype(w3_ref.dtype), w3_ref[...],
                 preferred_element_type=jnp.float32)          # (TB, 128) f32
    o_ref[...] = _selu(h3[:, :Z_DIM] + b3_ref[...]).astype(o_ref.dtype)


def _round_up(x, m):
    return ((x + m - 1) // m) * m


def prepare_params(params, matmul_dtype=jnp.bfloat16):
    """One-time layout transform.

    w3 is zero-padded to (256, 128) so the fc3 matmul is a dense MXU pass (the kernel
    discards the padded lanes before storing).  matmul_dtype selects the fc2/fc3 weight
    dtype (bf16 is MXU-native on every TPU generation); b1/b2/b3, layer-1 FMAs and SELU
    stay in f32.
    """
    w1, b1, w2, b2, w3, b3 = params
    w3p = jnp.zeros((HIDDEN, W3_PAD), w3.dtype).at[:, :Z_DIM].set(w3)
    return (w1, b1,
            w2.astype(matmul_dtype), b2,
            w3p.astype(matmul_dtype), b3)


def ff_forward(z, action, kparams, *, block_b=4096):
    """z: (B, Z_DIM) f32, action: (B, 1) int32, kparams from prepare_params().
    Returns (B, Z_DIM) f32."""
    w1, b1, w2, b2, w3p, b3 = kparams
    B = z.shape[0]

    # torch: cat((z, action.float()), dim=1) — tiny, single per-step input DMA.
    x = jnp.concatenate([z, action.astype(jnp.float32)], axis=1)   # (B, 3)

    # Balanced, 8-aligned batch tiles; at least 2 grid steps whenever B permits so the
    # "parallel" axis spans both TensorCores on v7x; padding < 8 rows/tile on average.
    n = max(2, pl.cdiv(B, block_b))
    tb = max(8, min(block_b, _round_up(pl.cdiv(B, n), 8)))
    Bp = _round_up(B, tb)
    if Bp != B:                                  # pad ragged tail with zero rows
        x = jnp.pad(x, ((0, Bp - B), (0, 0)))

    full = lambda arr: pl.BlockSpec(arr.shape, lambda i: (0,) * arr.ndim)

    out = pl.pallas_call(
        ff_kernel,
        out_shape=jax.ShapeDtypeStruct((Bp, Z_DIM), jnp.float32),
        grid=(Bp // tb,),
        in_specs=[
            pl.BlockSpec((tb, IN_DIM), lambda i: (i, 0)),  # x block
            full(w1), full(b1),                            # weights: fully resident
            full(w2), full(b2),
            full(w3p), full(b3),
        ],
        out_specs=pl.BlockSpec((tb, Z_DIM), lambda i: (i, 0)),   # narrow output block
        compiler_params=pltpu.CompilerParams(
            dimension_semantics=("parallel",),             # batch tiles split across TCs
            vmem_limit_bytes=48 * 1024 * 1024,             # fits v7x's 64 MiB physical VMEM
        ),
    )(x, w1, b1, w2, b2, w3p, b3)

    return out if Bp == B else out[:B]


def init_params(key):
    """nn.Linear-style init (uniform +/- 1/sqrt(fan_in)); weights stored (in, out)."""
    def linear(key, fan_in, fan_out):
        kw, kb = jax.random.split(key)
        bound = 1.0 / jnp.sqrt(float(fan_in))
        w = jax.random.uniform(kw, (fan_in, fan_out), jnp.float32, -bound, bound)
        b = jax.random.uniform(kb, (1, fan_out), jnp.float32, -bound, bound)
        return w, b

    k1, k2, k3 = jax.random.split(key, 3)
    w1, b1 = linear(k1, IN_DIM, HIDDEN)
    w2, b2 = linear(k2, HIDDEN, HIDDEN)
    w3, b3 = linear(k3, HIDDEN, Z_DIM)
    return (w1, b1, w2, b2, w3, b3)


def ff_reference(z, action, params):
    w1, b1, w2, b2, w3, b3 = params
    x = jnp.concatenate([z, action.astype(jnp.float32)], axis=1)
    h = jax.nn.selu(x @ w1 + b1)
    h = jax.nn.selu(h @ w2 + b2)
    return jax.nn.selu(h @ w3 + b3)


if __name__ == "__main__":
    key = jax.random.PRNGKey(0)
    kp, kz, ka = jax.random.split(key, 3)

    params = init_params(kp)

    # Small aligned batch.
    B = 8
    z = jax.random.normal(kz, (B, Z_DIM), jnp.float32)
    action = jax.random.randint(ka, (B, 1), 0, NB_ACTIONS, jnp.int32)
    ref = ff_reference(z, action, params)

    # f32 matmul-operand path (tight parity with the PyTorch f32 math).
    out_f32 = ff_forward(z, action, prepare_params(params, jnp.float32))
    jax.block_until_ready(out_f32)
    assert out_f32.shape == (B, Z_DIM)
    assert jnp.allclose(out_f32, ref, atol=2e-5, rtol=2e-5)

    # Default bf16 matmul-operand path (MXU-native on v5e/v6e/v7x); f32 accum + f32 SELU.
    out_bf16 = ff_forward(z, action, prepare_params(params))
    jax.block_until_ready(out_bf16)
    assert out_bf16.shape == (B, Z_DIM)
    assert jnp.allclose(out_bf16, ref, atol=5e-2, rtol=5e-2)

    # Ragged batch (exercises balanced tiling + zero-row padding + row-slice on return).
    Br = 13
    zr = jax.random.normal(kz, (Br, Z_DIM), jnp.float32)
    ar = jax.random.randint(ka, (Br, 1), 0, NB_ACTIONS, jnp.int32)
    out_r = ff_forward(zr, ar, prepare_params(params, jnp.float32))
    jax.block_until_ready(out_r)
    assert out_r.shape == (Br, Z_DIM)
    assert jnp.allclose(out_r, ff_reference(zr, ar, params), atol=2e-5, rtol=2e-5)

    print("KERNEL_OK")
</pallas_src>

<mosaic_0001>
module attributes {stable_mosaic.version = 11 : i64} {
  func.func @ff_kernel(%arg0: i32, %arg1: memref<8x3xf32, #tpu.memory_space<vmem>>, %arg2: memref<3x256xf32, #tpu.memory_space<vmem>>, %arg3: memref<1x256xf32, #tpu.memory_space<vmem>>, %arg4: memref<256x256xf32, #tpu.memory_space<vmem>>, %arg5: memref<1x256xf32, #tpu.memory_space<vmem>>, %arg6: memref<256x128xf32, #tpu.memory_space<vmem>>, %arg7: memref<1x2xf32, #tpu.memory_space<vmem>>, %arg8: memref<8x2xf32, #tpu.memory_space<vmem>>) attributes {dimension_semantics = [#tpu.dimension_semantics<parallel>], iteration_bounds = array<i64: 1>, scalar_prefetch = 0 : i64, scratch_operands = 0 : i64, tpu.core_type = #tpu.core_type<tc>, window_params = [{transform_indices = @transform_0, window_bounds = array<i64: 8, 3>}, {pipeline_mode = #tpu.pipeline_mode<synchronous>, transform_indices = @transform_1, window_bounds = array<i64: 3, 256>}, {pipeline_mode = #tpu.pipeline_mode<synchronous>, transform_indices = @transform_2, window_bounds = array<i64: 1, 256>}, {pipeline_mode = #tpu.pipeline_mode<synchronous>, transform_indices = @transform_3, window_bounds = array<i64: 256, 256>}, {pipeline_mode = #tpu.pipeline_mode<synchronous>, transform_indices = @transform_4, window_bounds = array<i64: 1, 256>}, {pipeline_mode = #tpu.pipeline_mode<synchronous>, transform_indices = @transform_5, window_bounds = array<i64: 256, 128>}, {pipeline_mode = #tpu.pipeline_mode<synchronous>, transform_indices = @transform_6, window_bounds = array<i64: 1, 2>}, {transform_indices = @transform_7, window_bounds = array<i64: 8, 2>}]} {
    %c0 = arith.constant 0 : index
    %c0_0 = arith.constant 0 : index
    %0 = vector.load %arg1[%c0, %c0_0] : memref<8x3xf32, #tpu.memory_space<vmem>>, vector<8x3xf32>
    %c0_1 = arith.constant 0 : index
    %c0_2 = arith.constant 0 : index
    %1 = vector.load %arg3[%c0_1, %c0_2] : memref<1x256xf32, #tpu.memory_space<vmem>>, vector<1x256xf32>
    %2 = vector.extract_strided_slice %0 {offsets = [0, 0], sizes = [8, 1], strides = [1, 1]} : vector<8x3xf32> to vector<8x1xf32>
    %c0_3 = arith.constant 0 : index
    %c0_4 = arith.constant 0 : index
    %3 = vector.load %arg2[%c0_3, %c0_4] : memref<3x256xf32, #tpu.memory_space<vmem>>, vector<1x256xf32>
    %4 = vector.broadcast %2 : vector<8x1xf32> to vector<8x256xf32>
    %5 = vector.broadcast %3 : vector<1x256xf32> to vector<8x256xf32>
    %6 = arith.mulf %4, %5 : vector<8x256xf32>
    %7 = vector.broadcast %1 : vector<1x256xf32> to vector<8x256xf32>
    %8 = arith.addf %7, %6 : vector<8x256xf32>
    %9 = vector.extract_strided_slice %0 {offsets = [0, 1], sizes = [8, 1], strides = [1, 1]} : vector<8x3xf32> to vector<8x1xf32>
    %c1 = arith.constant 1 : index
    %c0_5 = arith.constant 0 : index
    %10 = vector.load %arg2[%c1, %c0_5] : memref<3x256xf32, #tpu.memory_space<vmem>>, vector<1x256xf32>
    %11 = vector.broadcast %9 : vector<8x1xf32> to vector<8x256xf32>
    %12 = vector.broadcast %10 : vector<1x256xf32> to vector<8x256xf32>
    %13 = arith.mulf %11, %12 : vector<8x256xf32>
    %14 = arith.addf %8, %13 : vector<8x256xf32>
    %15 = vector.extract_strided_slice %0 {offsets = [0, 2], sizes = [8, 1], strides = [1, 1]} : vector<8x3xf32> to vector<8x1xf32>
    %c2 = arith.constant 2 : index
    %c0_6 = arith.constant 0 : index
    %16 = vector.load %arg2[%c2, %c0_6] : memref<3x256xf32, #tpu.memory_space<vmem>>, vector<1x256xf32>
    %17 = vector.broadcast %15 : vector<8x1xf32> to vector<8x256xf32>
    %18 = vector.broadcast %16 : vector<1x256xf32> to vector<8x256xf32>
    %19 = arith.mulf %17, %18 : vector<8x256xf32>
    %20 = arith.addf %14, %19 : vector<8x256xf32>
    %cst = arith.constant 0.000000e+00 : f32
    %21 = vector.broadcast %cst : f32 to vector<8x256xf32>
    %22 = arith.minimumf %20, %21 : vector<8x256xf32>
    %cst_7 = arith.constant 0.000000e+00 : f32
    %23 = vector.broadcast %cst_7 : f32 to vector<8x256xf32>
    %24 = arith.cmpf ogt, %20, %23 : vector<8x256xf32>
    %25 = math.exp %22 : vector<8x256xf32>
    %cst_8 = arith.constant 1.000000e+00 : f32
    %26 = vector.broadcast %cst_8 : f32 to vector<8x256xf32>
    %27 = arith.subf %25, %26 : vector<8x256xf32>
    %cst_9 = arith.constant 1.67326319 : f32
    %28 = vector.broadcast %cst_9 : f32 to vector<8x256xf32>
    %29 = arith.mulf %28, %27 : vector<8x256xf32>
    %30 = arith.select %24, %20, %29 : vector<8x256xi1>, vector<8x256xf32>
    %cst_10 = arith.constant 1.05070102 : f32
    %31 = vector.broadcast %cst_10 : f32 to vector<8x256xf32>
    %32 = arith.mulf %31, %30 : vector<8x256xf32>
    %c0_11 = arith.constant 0 : index
    %c0_12 = arith.constant 0 : index
    %33 = vector.load %arg4[%c0_11, %c0_12] : memref<256x256xf32, #tpu.memory_space<vmem>>, vector<256x256xf32>
    %cst_13 = arith.constant dense<0.000000e+00> : vector<8x256xf32>
    %34 = tpu.matmul %32, %33, %cst_13 {dimension_numbers = #tpu.dot_dimension_numbers<[1], [0], [0], [1], [0, 0, 1, 1], [], []>} : vector<8x256xf32>, vector<256x256xf32>, vector<8x256xf32> -> vector<8x256xf32>
    %c0_14 = arith.constant 0 : index
    %c0_15 = arith.constant 0 : index
    %35 = vector.load %arg5[%c0_14, %c0_15] : memref<1x256xf32, #tpu.memory_space<vmem>>, vector<1x256xf32>
    %36 = vector.broadcast %35 : vector<1x256xf32> to vector<8x256xf32>
    %37 = arith.addf %34, %36 : vector<8x256xf32>
    %cst_16 = arith.constant 0.000000e+00 : f32
    %38 = vector.broadcast %cst_16 : f32 to vector<8x256xf32>
    %39 = arith.minimumf %37, %38 : vector<8x256xf32>
    %cst_17 = arith.constant 0.000000e+00 : f32
    %40 = vector.broadcast %cst_17 : f32 to vector<8x256xf32>
    %41 = arith.cmpf ogt, %37, %40 : vector<8x256xf32>
    %42 = math.exp %39 : vector<8x256xf32>
    %cst_18 = arith.constant 1.000000e+00 : f32
    %43 = vector.broadcast %cst_18 : f32 to vector<8x256xf32>
    %44 = arith.subf %42, %43 : vector<8x256xf32>
    %cst_19 = arith.constant 1.67326319 : f32
    %45 = vector.broadcast %cst_19 : f32 to vector<8x256xf32>
    %46 = arith.mulf %45, %44 : vector<8x256xf32>
    %47 = arith.select %41, %37, %46 : vector<8x256xi1>, vector<8x256xf32>
    %cst_20 = arith.constant 1.05070102 : f32
    %48 = vector.broadcast %cst_20 : f32 to vector<8x256xf32>
    %49 = arith.mulf %48, %47 : vector<8x256xf32>
    %c0_21 = arith.constant 0 : index
    %c0_22 = arith.constant 0 : index
    %50 = vector.load %arg6[%c0_21, %c0_22] : memref<256x128xf32, #tpu.memory_space<vmem>>, vector<256x128xf32>
    %cst_23 = arith.constant dense<0.000000e+00> : vector<8x128xf32>
    %51 = tpu.matmul %49, %50, %cst_23 {dimension_numbers = #tpu.dot_dimension_numbers<[1], [0], [0], [1], [0, 0, 1, 1], [], []>} : vector<8x256xf32>, vector<256x128xf32>, vector<8x128xf32> -> vector<8x128xf32>
    %52 = vector.extract_strided_slice %51 {offsets = [0, 0], sizes = [8, 2], strides = [1, 1]} : vector<8x128xf32> to vector<8x2xf32>
    %c0_24 = arith.constant 0 : index
    %c0_25 = arith.constant 0 : index
    %53 = vector.load %arg7[%c0_24, %c0_25] : memref<1x2xf32, #tpu.memory_space<vmem>>, vector<1x2xf32>
    %54 = vector.broadcast %53 : vector<1x2xf32> to vector<8x2xf32>
    %55 = arith.addf %52, %54 : vector<8x2xf32>
    %cst_26 = arith.constant 0.000000e+00 : f32
    %56 = vector.broadcast %cst_26 : f32 to vector<8x2xf32>
    %57 = arith.minimumf %55, %56 : vector<8x2xf32>
    %cst_27 = arith.constant 0.000000e+00 : f32
    %58 = vector.broadcast %cst_27 : f32 to vector<8x2xf32>
    %59 = arith.cmpf ogt, %55, %58 : vector<8x2xf32>
    %60 = math.exp %57 : vector<8x2xf32>
    %cst_28 = arith.constant 1.000000e+00 : f32
    %61 = vector.broadcast %cst_28 : f32 to vector<8x2xf32>
    %62 = arith.subf %60, %61 : vector<8x2xf32>
    %cst_29 = arith.constant 1.67326319 : f32
    %63 = vector.broadcast %cst_29 : f32 to vector<8x2xf32>
    %64 = arith.mulf %63, %62 : vector<8x2xf32>
    %65 = arith.select %59, %55, %64 : vector<8x2xi1>, vector<8x2xf32>
    %cst_30 = arith.constant 1.05070102 : f32
    %66 = vector.broadcast %cst_30 : f32 to vector<8x2xf32>
    %67 = arith.mulf %66, %65 : vector<8x2xf32>
    %c0_31 = arith.constant 0 : index
    %c0_32 = arith.constant 0 : index
    %68 = vector.load %arg8[%c0_31, %c0_32] : memref<8x2xf32, #tpu.memory_space<vmem>>, vector<8x2xf32>
    tpu.vector_store %arg8[%c0_31, %c0_32], %67 {strides = array<i32>} : memref<8x2xf32, #tpu.memory_space<vmem>>, vector<8x2xf32>,
    return
  }
  func.func @transform_0(%arg0: i32) -> (i32, i32) {
    %c0_i32 = arith.constant 0 : i32
    %c0_i32_0 = arith.constant 0 : i32
    return %arg0, %c0_i32 : i32, i32
  }
  func.func @transform_1(%arg0: i32) -> (i32, i32) {
    %c0_i32 = arith.constant 0 : i32
    %c0_i32_0 = arith.constant 0 : i32
    %c0_i32_1 = arith.constant 0 : i32
    return %c0_i32, %c0_i32_0 : i32, i32
  }
  func.func @transform_2(%arg0: i32) -> (i32, i32) {
    %c0_i32 = arith.constant 0 : i32
    %c0_i32_0 = arith.constant 0 : i32
    %c0_i32_1 = arith.constant 0 : i32
    return %c0_i32, %c0_i32_0 : i32, i32
  }
  func.func @transform_3(%arg0: i32) -> (i32, i32) {
    %c0_i32 = arith.constant 0 : i32
    %c0_i32_0 = arith.constant 0 : i32
    %c0_i32_1 = arith.constant 0 : i32
    return %c0_i32, %c0_i32_0 : i32, i32
  }
  func.func @transform_4(%arg0: i32) -> (i32, i32) {
    %c0_i32 = arith.constant 0 : i32
    %c0_i32_0 = arith.constant 0 : i32
    %c0_i32_1 = arith.constant 0 : i32
    return %c0_i32, %c0_i32_0 : i32, i32
  }
  func.func @transform_5(%arg0: i32) -> (i32, i32) {
    %c0_i32 = arith.constant 0 : i32
    %c0_i32_0 = arith.constant 0 : i32
    %c0_i32_1 = arith.constant 0 : i32
    return %c0_i32, %c0_i32_0 : i32, i32
  }
  func.func @transform_6(%arg0: i32) -> (i32, i32) {
    %c0_i32 = arith.constant 0 : i32
    %c0_i32_0 = arith.constant 0 : i32
    %c0_i32_1 = arith.constant 0 : i32
    return %c0_i32, %c0_i32_0 : i32, i32
  }
  func.func @transform_7(%arg0: i32) -> (i32, i32) {
    %c0_i32 = arith.constant 0 : i32
    %c0_i32_0 = arith.constant 0 : i32
    return %arg0, %c0_i32 : i32, i32
  }
}

</mosaic_0001>

<bundles_post_ra>
// kernel: tpu_custom_call.1
= control target key start
LH: loop header
LB: loop body
LE: loop exit
PB: predicated region body
PF: predicated region fallthrough
CT: control target
= control target key end

     0   :  { %12 = vsyncpa [#allocation3], 0  ;;  %s756_s0 = inlined_call_operand.vmem [shape: f32[8,3], index: 0, kind: input, shape index: {}]   ;;  %s757_s1 = inlined_call_operand.vmem [shape: f32[3,256], index: 1, kind: input, shape index: {}]   ;;  %s758_s2 = inlined_call_operand.vmem [shape: f32[1,256], index: 2, kind: input, shape index: {}]   ;;  %s759_s3 = inlined_call_operand.hbm [shape: f32[256,256], index: 3, kind: input, shape index: {}]   ;;  %s760_s4 = inlined_call_operand.vmem [shape: f32[1,256], index: 4, kind: input, shape index: {}]   ;;  %s761_s5 = inlined_call_operand.hbm [shape: f32[256,128], index: 5, kind: input, shape index: {}]   ;;  %s762_s6 = inlined_call_operand.vmem [shape: f32[1,2], index: 6, kind: input, shape index: {}]   ;;  %s763_s7 = inlined_call_operand.vmem [shape: f32[8,2], index: 7, kind: output, shape index: {}]  }
   0x1   :  { %13 = vsyncpa [#allocation5], 0  ;;  %s645_s24 = smov [#allocation2]   ;;  %s597_s28 = scalar_lea.hbm %s759_s3, 8192 }
   0x2   :  { %s25_s25 = sshll.u32 %s645_s24, 4  ;;  %p598_p0 = scmp.ne.s32.totalorder %s759_s3, %s597_s28  ;;  %s26_s25 = int_to_ptr.vmem [resolvable:$true] %s25_s25 }
   0x3   :  { %p601_p1 = scmp.lt.u32.totalorder %s597_s28, %s759_s3 }
   0x5   :  { %p603_p2 = pnand %p601_p1, %p598_p0 }
   0x7   :  { %606 = shalt.err (!%p603_p2)
}
   0x8   :  { %s607_s10 = scalar_lea.vmem %s26_s25, 8192  ;;  %p612_p4 = scmp.lt.s32.totalorder %s26_s25, %s26_s25 }
   0x9   :  { %p608_p3 = scmp.ne.s32.totalorder %s26_s25, %s607_s10  ;;  %p613_p5 = scmp.lt.s32.totalorder %s607_s10, %s607_s10 }
   0xb   :  { %p614_p6 = por %p613_p5, %p612_p4 }
   0xd   :  { %p615_p7 = pnand %p614_p6, %p608_p3 }
   0xf   :  { %618 = shalt.err (!%p615_p7)
}
  0x10   :  { %s646_s11 = smov 256   ;;  %s647_s12 = smov 16  }
  0x11   :  { %31 = dma.hbm_to_vmem [thread:$0]  %s759_s3, 8192, %s26_s25, [#allocation3], %s646_s11, %s646_s11, %s647_s12  }
  0x12   :  { %s648_s15 = smov [#allocation4]   ;;  %s619_s19 = scalar_lea.hbm %s761_s5, 4096 }
  0x13   :  { %s39_s16 = sshll.u32 %s648_s15, 4  ;;  %p620_p8 = scmp.ne.s32.totalorder %s761_s5, %s619_s19  ;;  %s40_s16 = int_to_ptr.vmem [resolvable:$true] %s39_s16 }
  0x14   :  { %p623_p9 = scmp.lt.u32.totalorder %s619_s19, %s761_s5 }
  0x16   :  { %p625_p10 = pnand %p623_p9, %p620_p8 }
  0x18   :  { %628 = shalt.err (!%p625_p10)
}
  0x19   :  { %s629_s24 = scalar_lea.vmem %s40_s16, 4096  ;;  %p634_p12 = scmp.lt.s32.totalorder %s40_s16, %s40_s16 }
  0x1a   :  { %p630_p11 = scmp.ne.s32.totalorder %s40_s16, %s629_s24  ;;  %p635_p13 = scmp.lt.s32.totalorder %s629_s24, %s629_s24 }
  0x1c   :  { %p636_p0 = por %p635_p13, %p634_p12 }
  0x1e   :  { %p637_p1 = pnand %p636_p0, %p630_p11 }
  0x20   :  { %640 = shalt.err (!%p637_p1)
}
  0x21   :  { %s649_s3 = smov 128   ;;  %s650_s25 = smov 8  }
  0x22   :  { %45 = dma.hbm_to_vmem [thread:$0]  %s761_s5, 4096, %s40_s16, [#allocation5], %s649_s3, %s649_s3, %s650_s25  }
  0x23   :  { %641 = dma.done.wait [#allocation3], 8192  }
  0x24   :  { %642 = vsyncadd [#allocation3], 4294959104 }
  0x25   :  { %643 = dma.done.wait [#allocation5], 4096  }
  0x26   :  { %644 = vsyncadd [#allocation5], 4294963200  ;;  %v651_v0 = vmov 0   ;;  %v652_v1 = vmov 2   ;;  %v54_v2 = vld [vmem:[%s756_s0] sm:$0xff]  ;;  %v147_v3 = vld [vmem:[#allocation2 + $0x8] sm:$0xff] }
  0x27   :  { %583 = vset.pattern.permute.xlu0 %v651_v0  ;;  %585 = vset.pattern.permute.xlu1 %v652_v1  ;;  %v149_v4 = vld [vmem:[#allocation2 + $0x18] sm:$0xff]  ;;  %v146_v6 = vld [vmem:[#allocation2] sm:$0xff]  ;;  %v148_v7 = vld [vmem:[#allocation2 + $0x10] sm:$0xff]  ;;  %v653_v17 = vmov 1   ;;  %vm427_vm5 = vcmask 15360  }
  0x28   :  { %59 = vperm.xlu0 %583, %v54_v2   ;;  %112 = vperm.xlu1 %585, %v54_v2   ;;  %v478_v5 = vpack.c.bf16 %v149_v4, %v147_v3  ;;  %v151_v8 = vld [vmem:[#allocation2 + $0x28] sm:$0xff]  ;;  %v480_v9 = vpack.c.bf16 %v148_v7, %v146_v6  ;;  %v153_v10 = vld [vmem:[#allocation2 + $0x38] sm:$0xff]  ;;  %v150_v11 = vld [vmem:[#allocation2 + $0x20] sm:$0xff] }
  0x29   :  { %v152_v12 = vld [vmem:[#allocation2 + $0x30] sm:$0xff]  ;;  %v482_v13 = vpack.c.bf16 %v153_v10, %v151_v8  ;;  %v155_v14 = vld [vmem:[#allocation2 + $0x48] sm:$0xff]  ;;  %v157_v15 = vld [vmem:[#allocation2 + $0x58] sm:$0xff] }
  0x2a   :  { %479 = vmatprep.subr.bf16.mxu0 %v478_v5  ;;  %v484_v16 = vpack.c.bf16 %v152_v12, %v150_v11  ;;  %v486_v18 = vpack.c.bf16 %v157_v15, %v155_v14  ;;  %v154_v19 = vld [vmem:[#allocation2 + $0x40] sm:$0xff]  ;;  %v156_v20 = vld [vmem:[#allocation2 + $0x50] sm:$0xff]  ;;  %v159_v21 = vld [vmem:[#allocation2 + $0x68] sm:$0xff] }
  0x2b   :  { %481 = vmatpush1.bf16.msra.mxu0 %v480_v9  ;;  %v161_v22 = vld [vmem:[#allocation2 + $0x78] sm:$0xff]  ;;  %v488_v23 = vpack.c.bf16 %v156_v20, %v154_v19  ;;  %v158_v25 = vld [vmem:[#allocation2 + $0x60] sm:$0xff]  ;;  %v160_v26 = vld [vmem:[#allocation2 + $0x70] sm:$0xff] }
  0x2c   :  { %584 = vset.pattern.permute.xlu0 %v653_v17  ;;  %483 = vmatprep.subr.bf16.mxu0 %v482_v13  ;;  %v490_v24 = vpack.c.bf16 %v161_v22, %v159_v21  ;;  %v163_v27 = vld [vmem:[#allocation2 + $0x88] sm:$0xff]  ;;  %v165_v28 = vld [vmem:[#allocation2 + $0x98] sm:$0xff]  ;;  %v492_v29 = vpack.c.bf16 %v160_v26, %v158_v25  ;;  %v162_v31 = vld [vmem:[#allocation2 + $0x80] sm:$0xff] }
  0x2d   :  { %91 = vperm.xlu0 %584, %v54_v2   ;;  %v494_v30 = vpack.c.bf16 %v165_v28, %v163_v27  ;;  %v164_v32 = vld [vmem:[#allocation2 + $0x90] sm:$0xff]  ;;  %v167_v33 = vld [vmem:[#allocation2 + $0xa8] sm:$0xff]  ;;  %v169_v34 = vld [vmem:[#allocation2 + $0xb8] sm:$0xff] }
  0x2e   :  { %v496_v35 = vpack.c.bf16 %v164_v32, %v162_v31  ;;  %v498_v36 = vpack.c.bf16 %v169_v34, %v167_v33  ;;  %v166_v37 = vld [vmem:[#allocation2 + $0xa0] sm:$0xff]  ;;  %v168_v38 = vld [vmem:[#allocation2 + $0xb0] sm:$0xff]  ;;  %v171_v39 = vld [vmem:[#allocation2 + $0xc8] sm:$0xff] }
  0x2f   :  { %485 = vmatpush1.bf16.msra.mxu0 %v484_v16  ;;  %v173_v40 = vld [vmem:[#allocation2 + $0xd8] sm:$0xff]  ;;  %v500_v41 = vpack.c.bf16 %v168_v38, %v166_v37  ;;  %v170_v43 = vld [vmem:[#allocation2 + $0xc0] sm:$0xff]  ;;  %v172_v44 = vld [vmem:[#allocation2 + $0xd0] sm:$0xff] }
  0x30   :  { %487 = vmatprep.subr.bf16.mxu0 %v486_v18  ;;  %v502_v42 = vpack.c.bf16 %v173_v40, %v171_v39  ;;  %v175_v45 = vld [vmem:[#allocation2 + $0xe8] sm:$0xff]  ;;  %v177_v46 = vld [vmem:[#allocation2 + $0xf8] sm:$0xff]  ;;  %v504_v47 = vpack.c.bf16 %v172_v44, %v170_v43  ;;  %v174_v49 = vld [vmem:[#allocation2 + $0xe0] sm:$0xff] }
  0x31   :  { %586 = vset.pattern.permute.xlu0 %v652_v1  ;;  %v506_v48 = vpack.c.bf16 %v177_v46, %v175_v45  ;;  %v176_v50 = vld [vmem:[#allocation2 + $0xf0] sm:$0xff]  ;;  %v179_v51 = vld [vmem:[#allocation2 + $0x108] sm:$0xff]  ;;  %v181_v52 = vld [vmem:[#allocation2 + $0x118] sm:$0xff]  ;;  %v63_v45 = vlaneseq }
  0x32   :  { %v508_v53 = vpack.c.bf16 %v176_v50, %v174_v49  ;;  %v510_v54 = vpack.c.bf16 %v181_v52, %v179_v51  ;;  %v178_v55 = vld [vmem:[#allocation2 + $0x100] sm:$0xff]  ;;  %v180_v56 = vld [vmem:[#allocation2 + $0x110] sm:$0xff]  ;;  %v183_v57 = vld [vmem:[#allocation2 + $0x128] sm:$0xff] }
  0x33   :  { %489 = vmatpush1.bf16.msra.mxu0 %v488_v23  ;;  %v185_v58 = vld [vmem:[#allocation2 + $0x138] sm:$0xff]  ;;  %v512_v59 = vpack.c.bf16 %v180_v56, %v178_v55  ;;  %v182_v61 = vld [vmem:[#allocation2 + $0x120] sm:$0xff]  ;;  %v184_v62 = vld [vmem:[#allocation2 + $0x130] sm:$0xff]  ;;  %v64_v46 = vshrl.u32 %v63_v45, 7 }
  0x34   :  { %491 = vmatprep.subr.bf16.mxu0 %v490_v24  ;;  %v514_v60 = vpack.c.bf16 %v185_v58, %v183_v57  ;;  %v187_v63 = vld [vmem:[#allocation2 + $0x148] sm:$0xff]  ;;  %v189_v0 = vld [vmem:[#allocation2 + $0x158] sm:$0xff]  ;;  %v186_v1 = vld [vmem:[#allocation2 + $0x140] sm:$0xff]  ;;  %v516_v3 = vpack.c.bf16 %v184_v62, %v182_v61 }
  0x35   :  { %v188_v2 = vld [vmem:[#allocation2 + $0x150] sm:$0xff]  ;;  %v325_v4 = vld [vmem:[#allocation4 + $0x80] sm:$0xff]  ;;  %v326_v5 = vld [vmem:[#allocation4 + $0x88] sm:$0xff]  ;;  %v518_v7 = vpack.c.bf16 %v189_v0, %v187_v63 }
  0x36   :  { %v309_v6 = vld [vmem:[#allocation4] sm:$0xff]  ;;  %v542_v8 = vpack.c.bf16 %v326_v5, %v325_v4  ;;  %v310_v9 = vld [vmem:[#allocation4 + $0x8] sm:$0xff]  ;;  %v327_v10 = vld [vmem:[#allocation4 + $0x90] sm:$0xff]  ;;  %v520_v16 = vpack.c.bf16 %v188_v2, %v186_v1 }
  0x37   :  { %493 = vmatpush1.bf16.msra.mxu0 %v492_v29  ;;  %v328_v11 = vld [vmem:[#allocation4 + $0x98] sm:$0xff]  ;;  %v191_v12 = vld [vmem:[#allocation2 + $0x168] sm:$0xff]  ;;  %v544_v14 = vpack.c.bf16 %v310_v9, %v309_v6  ;;  %v190_v18 = vld [vmem:[#allocation2 + $0x160] sm:$0xff] }
  0x38   :  { %495 = vmatprep.subr.bf16.mxu0 %v494_v30  ;;  %v193_v13 = vld [vmem:[#allocation2 + $0x178] sm:$0xff]  ;;  %v546_v15 = vpack.c.bf16 %v328_v11, %v327_v10  ;;  %543 = vmatprep.subr.bf16.mxu1 %v542_v8  ;;  %v192_v19 = vld [vmem:[#allocation2 + $0x170] sm:$0xff]  ;;  %v195_v20 = vld [vmem:[#allocation2 + $0x188] sm:$0xff] }
  0x39   :  { %545 = vmatpush3.bf16.msra.mxu1 %v544_v14  ;;  %v522_v17 = vpack.c.bf16 %v193_v13, %v191_v12  ;;  %v197_v21 = vld [vmem:[#allocation2 + $0x198] sm:$0xff]  ;;  %v524_v22 = vpack.c.bf16 %v192_v19, %v190_v18  ;;  %v194_v24 = vld [vmem:[#allocation2 + $0x180] sm:$0xff]  ;;  %v196_v25 = vld [vmem:[#allocation2 + $0x190] sm:$0xff] }
  0x3a   :  { %547 = vmatprep.subr.bf16.mxu1 %v546_v15  ;;  %v526_v23 = vpack.c.bf16 %v197_v21, %v195_v20  ;;  %v199_v26 = vld [vmem:[#allocation2 + $0x1a8] sm:$0xff]  ;;  %v201_v27 = vld [vmem:[#allocation2 + $0x1b8] sm:$0xff]  ;;  %v528_v28 = vpack.c.bf16 %v196_v25, %v194_v24  ;;  %v198_v30 = vld [vmem:[#allocation2 + $0x1a0] sm:$0xff] }
  0x3b   :  { %497 = vmatpush1.bf16.msra.mxu0 %v496_v35  ;;  %v530_v29 = vpack.c.bf16 %v201_v27, %v199_v26  ;;  %v200_v31 = vld [vmem:[#allocation2 + $0x1b0] sm:$0xff]  ;;  %v203_v32 = vld [vmem:[#allocation2 + $0x1c8] sm:$0xff]  ;;  %v205_v33 = vld [vmem:[#allocation2 + $0x1d8] sm:$0xff] }
  0x3c   :  { %499 = vmatprep.subr.bf16.mxu0 %v498_v36  ;;  %v532_v34 = vpack.c.bf16 %v200_v31, %v198_v30  ;;  %v534_v35 = vpack.c.bf16 %v205_v33, %v203_v32  ;;  %v202_v36 = vld [vmem:[#allocation2 + $0x1c0] sm:$0xff]  ;;  %v204_v37 = vld [vmem:[#allocation2 + $0x1d0] sm:$0xff]  ;;  %v207_v38 = vld [vmem:[#allocation2 + $0x1e8] sm:$0xff] }
  0x3d   :  { %v209_v39 = vld [vmem:[#allocation2 + $0x1f8] sm:$0xff]  ;;  %v536_v40 = vpack.c.bf16 %v204_v37, %v202_v36  ;;  %v208_v43 = vld [vmem:[#allocation2 + $0x1f0] sm:$0xff]  ;;  %v330_v30 = vld [vmem:[#allocation4 + $0xa8] sm:$0xff] }
  0x3e   :  { %v56_v49 = vld [vmem:[%s757_s1] ss:$4 sm:$0x3]  ;;  %v311_v26 = vld [vmem:[#allocation4 + $0x10] sm:$0xff]  ;;  %v313_v32 = vld [vmem:[#allocation4 + $0x20] sm:$0xff] }
  0x3f   :  { %501 = vmatpush1.bf16.msra.mxu0 %v500_v41  ;;  %v538_v41 = vpack.c.bf16 %v209_v39, %v207_v38  ;;  %v55_v50 = vld [vmem:[%s758_s2] sm:$0x3]  ;;  %v314_v33 = vld [vmem:[#allocation4 + $0x28] sm:$0xff]  ;;  %v315_v38 = vld [vmem:[#allocation4 + $0x30] sm:$0xff] }
  0x40   :  { %503 = vmatprep.subr.bf16.mxu0 %v502_v42  ;;  %v206_v42 = vld [vmem:[#allocation2 + $0x1e0] sm:$0xff]  ;;  %v312_v27 = vld [vmem:[#allocation4 + $0x18] sm:$0xff]  ;;  %v318_v45 = vld [vmem:[#allocation4 + $0x48] sm:$0xff] }
  0x41   :  { %v540_v44 = vpack.c.bf16 %v208_v43, %v206_v42  ;;  %v332_v36 = vld [vmem:[#allocation4 + $0xb8] sm:$0xff]  ;;  %v334_v42 = vld [vmem:[#allocation4 + $0xc8] sm:$0xff] }
  0x42   :  { %v316_v39 = vld [vmem:[#allocation4 + $0x38] sm:$0xff] }
  0x43   :  { %505 = vmatpush1.bf16.msra.mxu0 %v504_v47  ;;  %v721_v47 = vsub.s32 0, %v64_v46 }
  0x44   :  { %507 = vmatprep.subr.bf16.mxu0 %v506_v48  ;;  %v723_v48 = vsub.s32 1, %v64_v46 }
  0x45   :  { %v66_v51 = vrot.slane %v56_v49, %v721_v47  ;;  %v79_v56 = vrot.slane %v55_v50, %v721_v47 }
  0x46   :  { %v70_v52 = vrot.slane %v56_v49, %v723_v48  ;;  %v83_v57 = vrot.slane %v55_v50, %v723_v48  ;;  %v335_v49 = vld [vmem:[#allocation4 + $0xd0] sm:$0xff]  ;;  %v336_v50 = vld [vmem:[#allocation4 + $0xd8] sm:$0xff] }
  0x47   :  { %509 = vmatpush1.bf16.msra.mxu0 %v508_v53  ;;  %v436_v53 = vld [vmem:[%s757_s1 + $0x2] ss:$4 sm:$0x3] }
  0x48   :  { %511 = vmatprep.subr.bf16.mxu0 %v510_v54  ;;  %v435_v54 = vld [vmem:[%s757_s1 + $0x1] ss:$4 sm:$0x3]  ;;  %v119_v58 = vrot.slane %v436_v53, %v721_v47 }
  0x49   :  { %v98_v62 = vrot.slane %v435_v54, %v721_v47  ;;  %v102_v63 = vrot.slane %v435_v54, %v723_v48 }
  0x4b   :  { %513 = vmatpush1.bf16.msra.mxu0 %v512_v59  ;;  %v123_v59 = vrot.slane %v436_v53, %v723_v48  ;;  %v320_v53 = vld [vmem:[#allocation4 + $0x58] sm:$0xff] }
  0x4c   :  { %515 = vmatprep.subr.bf16.mxu0 %v514_v60 }
  0x4f   :  { %517 = vmatpush1.bf16.msra.mxu0 %v516_v3 }
  0x50   :  { %519 = vmatprep.subr.bf16.mxu0 %v518_v7 }
  0x53   :  { %521 = vmatpush1.bf16.msra.mxu0 %v520_v16 }
  0x54   :  { %523 = vmatprep.subr.bf16.mxu0 %v522_v17 }
  0x57   :  { %525 = vmatpush1.bf16.msra.mxu0 %v524_v22 }
  0x58   :  { %527 = vmatprep.subr.bf16.mxu0 %v526_v23 }
  0x5b   :  { %529 = vmatpush1.bf16.msra.mxu0 %v528_v28  ;;  %v548_v28 = vpack.c.bf16 %v312_v27, %v311_v26 }
  0x5c   :  { %531 = vmatprep.subr.bf16.mxu0 %v530_v29  ;;  %v329_v29 = vld [vmem:[#allocation4 + $0xa0] sm:$0xff] }
  0x5d   :  { %549 = vmatpush3.bf16.msra.mxu1 %v548_v28  ;;  %v550_v31 = vpack.c.bf16 %v330_v30, %v329_v29 }
  0x5f   :  { %533 = vmatpush1.bf16.msra.mxu0 %v532_v34  ;;  %v552_v34 = vpack.c.bf16 %v314_v33, %v313_v32  ;;  %551 = vmatprep.subr.bf16.mxu1 %v550_v31 }
  0x60   :  { %535 = vmatprep.subr.bf16.mxu0 %v534_v35  ;;  %v331_v35 = vld [vmem:[#allocation4 + $0xb0] sm:$0xff] }
  0x61   :  { %553 = vmatpush3.bf16.msra.mxu1 %v552_v34  ;;  %v554_v37 = vpack.c.bf16 %v332_v36, %v331_v35 }
  0x63   :  { %537 = vmatpush1.bf16.msra.mxu0 %v536_v40  ;;  %v556_v40 = vpack.c.bf16 %v316_v39, %v315_v38  ;;  %555 = vmatprep.subr.bf16.mxu1 %v554_v37 }
  0x64   :  { %539 = vmatprep.subr.bf16.mxu0 %v538_v41  ;;  %v333_v41 = vld [vmem:[#allocation4 + $0xc0] sm:$0xff] }
  0x65   :  { %557 = vmatpush3.bf16.msra.mxu1 %v556_v40  ;;  %v558_v43 = vpack.c.bf16 %v334_v42, %v333_v41 }
  0x67   :  { %541 = vmatpush1.bf16.msra.mxu0 %v540_v44  ;;  %v317_v44 = vld [vmem:[#allocation4 + $0x40] sm:$0xff]  ;;  %559 = vmatprep.subr.bf16.mxu1 %v558_v43 }
  0x68   :  { %v560_v46 = vpack.c.bf16 %v318_v45, %v317_v44 }
  0x6a   :  { %561 = vmatpush3.bf16.msra.mxu1 %v560_v46 }
  0xa7   :  { %v60_v55 = vpop.permute.xlu0 %59  ;;  %v113_v0 = vpop.permute.xlu1 %112 }
  0xa8   :  { %v73_v60 = vmul.f32 %v66_v51, %v60_v55  ;;  %v74_v61 = vmul.f32 %v70_v52, %v60_v55  ;;  %v126_v2 = vmul.f32 %v119_v58, %v113_v0  ;;  %v127_v3 = vmul.f32 %v123_v59, %v113_v0  ;;  %v319_v52 = vld [vmem:[#allocation4 + $0x50] sm:$0xff]  ;;  %v337_v55 = vld [vmem:[#allocation4 + $0xe0] sm:$0xff]  ;;  %v322_v59 = vld [vmem:[#allocation4 + $0x68] sm:$0xff] }
  0xa9   :  { %v562_v51 = vpack.c.bf16 %v336_v50, %v335_v49  ;;  %v564_v54 = vpack.c.bf16 %v320_v53, %v319_v52  ;;  %v321_v58 = vld [vmem:[#allocation4 + $0x60] sm:$0xff] }
  0xaa   :  { %v86_v4 = vadd.f32 %v79_v56, %v73_v60  ;;  %v87_v5 = vadd.f32 %v83_v57, %v74_v61  ;;  %v338_v56 = vld [vmem:[#allocation4 + $0xe8] sm:$0xff]  ;;  %v568_v60 = vpack.c.bf16 %v322_v59, %v321_v58  ;;  %v339_v61 = vld [vmem:[#allocation4 + $0xf0] sm:$0xff] }
  0xab   :  { %563 = vmatprep.subr.bf16.mxu1 %v562_v51  ;;  %v566_v57 = vpack.c.bf16 %v338_v56, %v337_v55 }
  0xac   :  { %v92_v1 = vpop.permute.xlu0 %91  ;;  %565 = vmatpush3.bf16.msra.mxu1 %v564_v54 }
  0xad   :  { %v105_v6 = vmul.f32 %v98_v62, %v92_v1  ;;  %v106_v7 = vmul.f32 %v102_v63, %v92_v1  ;;  %v340_v62 = vld [vmem:[#allocation4 + $0xf8] sm:$0xff]  ;;  %v323_v63 = vld [vmem:[#allocation4 + $0x70] sm:$0xff]  ;;  %567 = vmatprep.subr.bf16.mxu1 %v566_v57 }
  0xae   :  { %v570_v0 = vpack.c.bf16 %v340_v62, %v339_v61  ;;  %v324_v1 = vld [vmem:[#allocation4 + $0x78] sm:$0xff] }
  0xaf   :  { %v107_v8 = vadd.f32 %v105_v6, %v86_v4  ;;  %v108_v9 = vadd.f32 %v106_v7, %v87_v5 }
  0xb0   :  { %569 = vmatpush3.bf16.msra.mxu1 %v568_v60 }
  0xb1   :  { %v128_v10 = vadd.f32 %v126_v2, %v107_v8  ;;  %v129_v11 = vadd.f32 %v127_v3, %v108_v9  ;;  %v572_v2 = vpack.c.bf16 %v324_v1, %v323_v63  ;;  %571 = vmatprep.subr.bf16.mxu1 %v570_v0  ;;  %v210_v3 = vld [vmem:[%s760_s4] sm:$0x3] }
  0xb2   :  { %v215_v4 = vrot.slane %v210_v3, %v721_v47  ;;  %v219_v5 = vrot.slane %v210_v3, %v723_v48 }
  0xb3   :  { %v130_v12 = vmin.f32 %v128_v10, 0.0  ;;  %v131_v13 = vmin.f32 %v129_v11, 0.0  ;;  %vm132_vm0 = vcmp.gt.f32.partialorder %v128_v10, 0.0  ;;  %vm133_vm1 = vcmp.gt.f32.partialorder %v129_v11, 0.0 }
  0xb4   :  { %573 = vmatpush3.bf16.msra.mxu1 %v572_v2 }
  0xb5   :  { %v134_v14 = vmul.f32 1.442695, %v130_v12  ;;  %v136_v15 = vmul.f32 1.442695, %v131_v13 }
  0xb7   :  { %587 = vpow2.f32 %v134_v14 }
  0xb8   :  { %589 = vpow2.f32 %v136_v15 }
  0xc1   :  { %v588_v16 = vpop.eup %587 }
  0xc2   :  { %v590_v17 = vpop.eup %589  ;;  %v437_v18 = vadd.f32 -1.0, %v588_v16 }
  0xc3   :  { %v438_v19 = vadd.f32 -1.0, %v590_v17 }
  0xc4   :  { %v140_v20 = vmul.f32 1.6732632, %v437_v18 }
  0xc5   :  { %v141_v21 = vmul.f32 1.6732632, %v438_v19 }
  0xc6   :  { %v142_v22 = vsel %vm132_vm0, %v128_v10, %v140_v20 }
  0xc7   :  { %v143_v23 = vsel %vm133_vm1, %v129_v11, %v141_v21  ;;  %v144_v24 = vmul.f32 1.050701, %v142_v22 }
  0xc8   :  { %v145_v25 = vmul.f32 1.050701, %v143_v23 }
  0xca   :  { %286 = vmatprep.mubr.f32.mxu0 %v145_v25 }
  0xcb   :  { %287 = vmatmul.mubr.f32.vlgmr.msra.gmra.mrb[0].mxu0 %v144_v24  ;;  %v441_v24 = vld [vmem:[%s762_s6] ss:$0 sm:$0xff] }
 0x19e   :  { %v288_v6 = vpop.f32.mrb[0].mxu0 }
 0x19f   :  { %v289_v7 = vadd.f32 %v288_v6, %v215_v4  ;;  %v290_v8 = vpop.f32.mrb[1].mxu0 }
 0x1a0   :  { %v291_v9 = vadd.f32 %v290_v8, %v219_v5 }
 0x1a1   :  { %v293_v10 = vmin.f32 %v289_v7, 0.0  ;;  %vm295_vm2 = vcmp.gt.f32.partialorder %v289_v7, 0.0 }
 0x1a2   :  { %v294_v11 = vmin.f32 %v291_v9, 0.0  ;;  %vm296_vm3 = vcmp.gt.f32.partialorder %v291_v9, 0.0 }
 0x1a3   :  { %v297_v12 = vmul.f32 1.442695, %v293_v10 }
 0x1a4   :  { %v299_v13 = vmul.f32 1.442695, %v294_v11 }
 0x1a5   :  { %591 = vpow2.f32 %v297_v12 }
 0x1a6   :  { %593 = vpow2.f32 %v299_v13 }
 0x1af   :  { %v592_v14 = vpop.eup %591 }
 0x1b0   :  { %v594_v15 = vpop.eup %593  ;;  %v439_v16 = vadd.f32 -1.0, %v592_v14 }
 0x1b1   :  { %v440_v17 = vadd.f32 -1.0, %v594_v15 }
 0x1b2   :  { %v303_v18 = vmul.f32 1.6732632, %v439_v16 }
 0x1b3   :  { %v304_v19 = vmul.f32 1.6732632, %v440_v17 }
 0x1b4   :  { %v305_v47 = vsel %vm295_vm2, %v289_v7, %v303_v18 }
 0x1b5   :  { %v306_v48 = vsel %vm296_vm3, %v291_v9, %v304_v19  ;;  %v307_v21 = vmul.f32 1.050701, %v305_v47 }
 0x1b6   :  { %v308_v20 = vmul.f32 1.050701, %v306_v48 }
 0x1b8   :  { %405 = vmatprep.mubr.f32.mxu1 %v308_v20 }
 0x1b9   :  { %406 = vmatmul.mubr.f32.vlgmr.msra.gmra.mrb[0].mxu1 %v307_v21 }
 0x28c   :  { %v475_v22 = vpop.f32.mrb[0].mxu1 }
 0x28d   :  { %v476_v23 = vpop.f32.mrb[1].mxu1 }
 0x28e   :  { %v477_v25 = vadd.f32 %v476_v23, %v475_v22 }
 0x290   :  { %v418_v26 = vadd.f32 %v477_v25, %v441_v24 }
 0x292   :  { %v419_v27 = vmin.f32 %v418_v26, 0.0  ;;  %vm420_vm4 = vcmp.gt.f32.partialorder %v418_v26, 0.0 }
 0x294   :  { %v421_v28 = vmul.f32 1.442695, %v419_v27 }
 0x296   :  { %595 = vpow2.f32 %v421_v28 }
 0x2a0   :  { %v596_v29 = vpop.eup %595 }
 0x2a1   :  { %v442_v30 = vadd.f32 -1.0, %v596_v29 }
 0x2a3   :  { %v424_v31 = vmul.f32 1.6732632, %v442_v30 }
 0x2a5   :  { %v425_v32 = vsel %vm420_vm4, %v418_v26, %v424_v31 }
 0x2a6   :  { %v426_v33 = vmul.f32 1.050701, %v425_v32 }
 0x2a8   :  { %428 = vst.msk [vmem:[%s763_s7] sm:$0xff] %vm427_vm5, %v426_v33 }
 0x2a9   :  { %433 = vsyncpa [#allocation3], 1 }
 0x2aa   :  { %434 = vsyncpa [#allocation5], 1 }

</bundles_post_ra>
